<compile_context>
chip_gen: v7x
topology: tpu7x:2x2x1
jax: 0.10.0
libtpu: 0.0.40
codegen_flags: <defaults>
</compile_context>

<pallas_src>
import functools
import math

import jax
import jax.numpy as jnp
import numpy as np
from jax.experimental import pallas as pl
from jax.experimental.pallas import tpu as pltpu


# ----------------------------- helpers --------------------------------------

def _round_up(x, m):
    return ((x + m - 1) // m) * m


def _sublane_align(dtype):
    """Second-minor alignment: 8 rows for 32-bit, 16 for bf16/f16, 32 for 8-bit."""
    itemsize = jnp.dtype(dtype).itemsize
    return max(8, 32 // itemsize)


def _vmem_capacity_bytes():
    """Physical VMEM per TensorCore (64 MiB on v7x, 128 MiB on v5e/v6e)."""
    try:
        return int(pltpu.get_tpu_info().vmem_capacity_bytes)
    except Exception:
        return 64 * 1024 * 1024  # conservative fallback (v7x)


# ----------------------------- fused MLP kernel ------------------------------

def _fused_mlp_kernel(x_ref, *refs, num_layers):
    """Whole layer stack on one (TM, K0) activation tile; weights stay in VMEM."""
    o_ref = refs[-1]
    wb_refs = refs[:-1]
    compute_dtype = x_ref.dtype
    h = x_ref[...]
    for i in range(num_layers):
        w = wb_refs[2 * i][...]
        b = wb_refs[2 * i + 1][...]          # (1, N_i)
        # Native-dtype operands -> fast MXU path; accumulate in f32.
        y = jnp.dot(h, w, preferred_element_type=jnp.float32)
        y = y + b.astype(jnp.float32)
        if i < num_layers - 1:
            y = jnp.maximum(y, 0.0)          # ReLU
            # TODO(synk): training-mode dropout would mask here (pltpu.prng_*).
            h = y.astype(compute_dtype)
        else:
            h = y
    o_ref[...] = h.astype(o_ref.dtype)


def _fused_vmem_estimate(params, tm, k0, out_dim, dtype):
    isz = jnp.dtype(dtype).itemsize
    est = 2 * tm * k0 * isz                  # double-buffered input tile
    est += 2 * tm * out_dim * isz            # double-buffered output tile
    for (w, b) in params:
        est += 2 * (w.size + b.size) * jnp.dtype(w.dtype).itemsize
    max_hidden = max(w.shape[1] for (w, _) in params)
    est += 2 * tm * max_hidden * 4           # f32 intermediate activation
    return est


def mlp_fused_pallas(params, x2d, *, tm, vmem_cap):
    """Single pallas_call over M tiles; intermediates never leave VMEM."""
    M, K0 = x2d.shape
    dtype = x2d.dtype
    n_layers = len(params)
    out_dim = params[-1][0].shape[1]

    align_m = _sublane_align(dtype)
    TM = min(_round_up(M, align_m), tm)
    Mp = _round_up(M, TM)
    xp = x2d if Mp == M else jnp.pad(x2d, ((0, Mp - M), (0, 0)))

    wb_args = []
    in_specs = [pl.BlockSpec((TM, K0), lambda i: (i, 0))]
    for (w, b) in params:
        kd, nd = w.shape
        wb_args.append(w)
        wb_args.append(b.reshape(1, nd))
        in_specs.append(pl.BlockSpec((kd, nd), lambda i: (0, 0)))
        in_specs.append(pl.BlockSpec((1, nd), lambda i: (0, 0)))

    isz = jnp.dtype(dtype).itemsize
    flops = sum(2 * Mp * w.shape[0] * w.shape[1] for (w, _) in params)
    bytes_accessed = (
        xp.size * isz
        + sum((w.size + b.size) * jnp.dtype(w.dtype).itemsize for (w, b) in params)
        + Mp * out_dim * isz
    )

    out = pl.pallas_call(
        functools.partial(_fused_mlp_kernel, num_layers=n_layers),
        out_shape=jax.ShapeDtypeStruct((Mp, out_dim), dtype),
        grid_spec=pltpu.PrefetchScalarGridSpec(
            num_scalar_prefetch=0,
            grid=(Mp // TM,),
            in_specs=in_specs,
            out_specs=pl.BlockSpec((TM, out_dim), lambda i: (i, 0)),
        ),
        compiler_params=pltpu.CompilerParams(
            dimension_semantics=("parallel",),
            vmem_limit_bytes=min(vmem_cap // 2, 32 * 1024 * 1024),
        ),
        cost_estimate=pl.CostEstimate(
            flops=flops, transcendentals=0, bytes_accessed=bytes_accessed),
    )(xp, *wb_args)
    return out[:M]


# ----------------------------- per-layer tiled linear ------------------------

def _linear_kernel_acc(x_ref, w_ref, b_ref, o_ref, acc_ref, *, apply_relu):
    """One (TM, TN) output tile, accumulating over the K grid axis in f32."""
    k = pl.program_id(2)

    @pl.when(k == 0)
    def _():
        # Fold bias into the accumulator init (saves a VPU add in the epilogue).
        acc_ref[...] = jnp.broadcast_to(
            b_ref[...].astype(jnp.float32), acc_ref.shape)

    acc_ref[...] += jnp.dot(x_ref[...], w_ref[...],
                            preferred_element_type=jnp.float32)

    @pl.when(k == pl.num_programs(2) - 1)
    def _():
        y = acc_ref[...]
        if apply_relu:
            y = jnp.maximum(y, 0.0)
        o_ref[...] = y.astype(o_ref.dtype)


def _linear_kernel_single(x_ref, w_ref, b_ref, o_ref, *, apply_relu):
    """K fits in one tile: no k grid axis, no accumulator scratch."""
    y = jnp.dot(x_ref[...], w_ref[...], preferred_element_type=jnp.float32)
    y = y + b_ref[...].astype(jnp.float32)
    if apply_relu:
        y = jnp.maximum(y, 0.0)
    o_ref[...] = y.astype(o_ref.dtype)


def linear_pallas(x, w, b, *, apply_relu, tm=256, tn=512, tk=512):
    """y = x @ w + b (optional ReLU).  x: (M, K), w: (K, N), b: (N,)."""
    M, K = x.shape
    K2, N = w.shape
    assert K == K2 and b.shape == (N,)
    dtype = x.dtype
    isz = jnp.dtype(dtype).itemsize

    align_m = _sublane_align(dtype)
    TM = min(_round_up(M, align_m), tm)
    TN = min(_round_up(N, 128), tn)
    TK = min(_round_up(K, 128), tk)

    Mp, Kp, Np = _round_up(M, TM), _round_up(K, TK), _round_up(N, TN)
    xp = x if (Mp == M and Kp == K) else jnp.pad(x, ((0, Mp - M), (0, Kp - K)))
    wp = w if (Kp == K and Np == N) else jnp.pad(w, ((0, Kp - K), (0, Np - N)))
    bp = (b if Np == N else jnp.pad(b, (0, Np - N))).reshape(1, Np)

    nk = Kp // TK
    cost = pl.CostEstimate(
        flops=2 * Mp * Np * Kp,
        transcendentals=0,
        bytes_accessed=(xp.size + wp.size + bp.size + Mp * Np) * isz,
    )

    if nk == 1:
        out = pl.pallas_call(
            functools.partial(_linear_kernel_single, apply_relu=apply_relu),
            out_shape=jax.ShapeDtypeStruct((Mp, Np), dtype),
            grid_spec=pltpu.PrefetchScalarGridSpec(
                num_scalar_prefetch=0,
                grid=(Mp // TM, Np // TN),
                in_specs=[
                    pl.BlockSpec((TM, Kp), lambda i, j: (i, 0)),
                    pl.BlockSpec((Kp, TN), lambda i, j: (0, j)),
                    pl.BlockSpec((1, TN), lambda i, j: (0, j)),
                ],
                out_specs=pl.BlockSpec((TM, TN), lambda i, j: (i, j)),
            ),
            compiler_params=pltpu.CompilerParams(
                dimension_semantics=("parallel", "parallel")),
            cost_estimate=cost,
        )(xp, wp, bp)
    else:
        out = pl.pallas_call(
            functools.partial(_linear_kernel_acc, apply_relu=apply_relu),
            out_shape=jax.ShapeDtypeStruct((Mp, Np), dtype),
            grid_spec=pltpu.PrefetchScalarGridSpec(
                num_scalar_prefetch=0,
                grid=(Mp // TM, Np // TN, nk),
                in_specs=[
                    pl.BlockSpec((TM, TK), lambda i, j, k: (i, k)),
                    pl.BlockSpec((TK, TN), lambda i, j, k: (k, j)),
                    pl.BlockSpec((1, TN), lambda i, j, k: (0, j)),
                ],
                out_specs=pl.BlockSpec((TM, TN), lambda i, j, k: (i, j)),
                scratch_shapes=[pltpu.VMEM((TM, TN), jnp.float32)],
            ),
            compiler_params=pltpu.CompilerParams(
                dimension_semantics=("parallel", "parallel", "arbitrary")),
            cost_estimate=cost,
        )(xp, wp, bp)

    if Mp != M or Np != N:
        out = out[:M, :N]
    return out


# ----------------------------- MLP wrapper -----------------------------------

def init_mlp_params(key, input_dim, hidden_dim, output_dim, num_layers,
                    dtype=jnp.float32):
    """PyTorch-style Linear init: U(-1/sqrt(in_dim), 1/sqrt(in_dim)); weights (in, out)."""
    if num_layers == 1:
        dims = [(input_dim, output_dim)]
    else:
        dims = [(input_dim, hidden_dim)]
        dims += [(hidden_dim, hidden_dim)] * (num_layers - 2)
        dims += [(hidden_dim, output_dim)]
    params = []
    for in_d, out_d in dims:
        key, wk, bk = jax.random.split(key, 3)
        bound = 1.0 / math.sqrt(in_d)
        w = jax.random.uniform(wk, (in_d, out_d), dtype, -bound, bound)
        b = jax.random.uniform(bk, (out_d,), dtype, -bound, bound)
        params.append((w, b))
    return params


def mlp_forward(params, x):
    """Forward pass (eval mode: dropout = identity)."""
    lead = x.shape[:-1]
    h = x.reshape(-1, x.shape[-1])
    out_dim = params[-1][0].shape[1]

    M, K0 = h.shape
    dtype = h.dtype
    TM = min(_round_up(M, _sublane_align(dtype)), 256)

    vmem_cap = _vmem_capacity_bytes()
    fuse_budget = min(vmem_cap // 4, 24 * 1024 * 1024)
    est = _fused_vmem_estimate(params, TM, K0, out_dim, dtype)

    if est <= fuse_budget:
        out = mlp_fused_pallas(params, h, tm=TM, vmem_cap=vmem_cap)
    else:
        n = len(params)
        y = h
        for i, (w, b) in enumerate(params):
            y = linear_pallas(y, w, b, apply_relu=(i < n - 1))
        out = y
    return out.reshape(lead + (out_dim,))


def mlp_reference(params, x):
    """float64 numpy reference (eval mode)."""
    h = np.asarray(x, dtype=np.float64).reshape(-1, x.shape[-1])
    n = len(params)
    for i, (w, b) in enumerate(params):
        h = h @ np.asarray(w, np.float64) + np.asarray(b, np.float64)
        if i < n - 1:
            h = np.maximum(h, 0.0)
    return h.reshape(x.shape[:-1] + (params[-1][0].shape[1],))


# ----------------------------- main ------------------------------------------

if __name__ == "__main__":
    key = jax.random.PRNGKey(0)
    batch, input_dim, hidden_dim, output_dim, num_layers = 16, 64, 128, 32, 3

    key, xk, pk = jax.random.split(key, 3)
    x = jax.random.normal(xk, (batch, input_dim), dtype=jnp.float32)
    params = init_mlp_params(pk, input_dim, hidden_dim, output_dim, num_layers)

    out = jax.block_until_ready(mlp_forward(params, x))  # fused path
    ref = mlp_reference(params, x)
    np.testing.assert_allclose(np.asarray(out), ref, rtol=1e-4, atol=1e-4)

    # Also exercise the per-layer tiled path: non-divisible dims (padding),
    # single-K kernel, and the K-grid accumulate kernel.
    key, k1, k2, k3, k4, k5 = jax.random.split(key, 6)
    x2 = jax.random.normal(k1, (16, 72), dtype=jnp.float32)
    w2 = jax.random.normal(k2, (72, 96), dtype=jnp.float32) * 0.1
    b2 = jax.random.normal(k3, (96,), dtype=jnp.float32)
    y2 = jax.block_until_ready(linear_pallas(x2, w2, b2, apply_relu=True))
    ref2 = np.maximum(np.asarray(x2, np.float64) @ np.asarray(w2, np.float64)
                      + np.asarray(b2, np.float64), 0.0)
    np.testing.assert_allclose(np.asarray(y2), ref2, rtol=1e-4, atol=1e-4)

    x3 = jax.random.normal(k4, (16, 1024), dtype=jnp.float32) * 0.05
    w3 = jax.random.normal(k5, (1024, 256), dtype=jnp.float32) * 0.05
    b3 = jnp.zeros((256,), dtype=jnp.float32)
    y3 = jax.block_until_ready(linear_pallas(x3, w3, b3, apply_relu=False))
    ref3 = np.asarray(x3, np.float64) @ np.asarray(w3, np.float64)
    np.testing.assert_allclose(np.asarray(y3), ref3, rtol=1e-4, atol=1e-4)

    print("KERNEL_OK")
</pallas_src>

<mosaic_0001>
module attributes {stable_mosaic.version = 11 : i64} {
  func.func @_fused_mlp_kernel(%arg0: i32, %arg1: memref<16x64xf32, #tpu.memory_space<vmem>>, %arg2: memref<64x128xf32, #tpu.memory_space<vmem>>, %arg3: memref<1x128xf32, #tpu.memory_space<vmem>>, %arg4: memref<128x128xf32, #tpu.memory_space<vmem>>, %arg5: memref<1x128xf32, #tpu.memory_space<vmem>>, %arg6: memref<128x32xf32, #tpu.memory_space<vmem>>, %arg7: memref<1x32xf32, #tpu.memory_space<vmem>>, %arg8: memref<16x32xf32, #tpu.memory_space<vmem>>) attributes {dimension_semantics = [#tpu.dimension_semantics<parallel>], iteration_bounds = array<i64: 1>, scalar_prefetch = 0 : i64, scratch_operands = 0 : i64, tpu.core_type = #tpu.core_type<tc>, window_params = [{transform_indices = @transform_0, window_bounds = array<i64: 16, 64>}, {pipeline_mode = #tpu.pipeline_mode<synchronous>, transform_indices = @transform_1, window_bounds = array<i64: 64, 128>}, {pipeline_mode = #tpu.pipeline_mode<synchronous>, transform_indices = @transform_2, window_bounds = array<i64: 1, 128>}, {pipeline_mode = #tpu.pipeline_mode<synchronous>, transform_indices = @transform_3, window_bounds = array<i64: 128, 128>}, {pipeline_mode = #tpu.pipeline_mode<synchronous>, transform_indices = @transform_4, window_bounds = array<i64: 1, 128>}, {pipeline_mode = #tpu.pipeline_mode<synchronous>, transform_indices = @transform_5, window_bounds = array<i64: 128, 32>}, {pipeline_mode = #tpu.pipeline_mode<synchronous>, transform_indices = @transform_6, window_bounds = array<i64: 1, 32>}, {transform_indices = @transform_7, window_bounds = array<i64: 16, 32>}]} {
    %c0 = arith.constant 0 : index
    %c0_0 = arith.constant 0 : index
    %0 = vector.load %arg1[%c0, %c0_0] : memref<16x64xf32, #tpu.memory_space<vmem>>, vector<16x64xf32>
    %c0_1 = arith.constant 0 : index
    %c0_2 = arith.constant 0 : index
    %1 = vector.load %arg2[%c0_1, %c0_2] : memref<64x128xf32, #tpu.memory_space<vmem>>, vector<64x128xf32>
    %c0_3 = arith.constant 0 : index
    %c0_4 = arith.constant 0 : index
    %2 = vector.load %arg3[%c0_3, %c0_4] : memref<1x128xf32, #tpu.memory_space<vmem>>, vector<1x128xf32>
    %cst = arith.constant dense<0.000000e+00> : vector<16x128xf32>
    %3 = tpu.matmul %0, %1, %cst {dimension_numbers = #tpu.dot_dimension_numbers<[1], [0], [0], [1], [0, 0, 1, 1], [], []>} : vector<16x64xf32>, vector<64x128xf32>, vector<16x128xf32> -> vector<16x128xf32>
    %4 = vector.broadcast %2 : vector<1x128xf32> to vector<16x128xf32>
    %5 = arith.addf %3, %4 : vector<16x128xf32>
    %cst_5 = arith.constant 0.000000e+00 : f32
    %6 = vector.broadcast %cst_5 : f32 to vector<16x128xf32>
    %7 = arith.maximumf %5, %6 : vector<16x128xf32>
    %c0_6 = arith.constant 0 : index
    %c0_7 = arith.constant 0 : index
    %8 = vector.load %arg4[%c0_6, %c0_7] : memref<128x128xf32, #tpu.memory_space<vmem>>, vector<128x128xf32>
    %c0_8 = arith.constant 0 : index
    %c0_9 = arith.constant 0 : index
    %9 = vector.load %arg5[%c0_8, %c0_9] : memref<1x128xf32, #tpu.memory_space<vmem>>, vector<1x128xf32>
    %cst_10 = arith.constant dense<0.000000e+00> : vector<16x128xf32>
    %10 = tpu.matmul %7, %8, %cst_10 {dimension_numbers = #tpu.dot_dimension_numbers<[1], [0], [0], [1], [0, 0, 1, 1], [], []>} : vector<16x128xf32>, vector<128x128xf32>, vector<16x128xf32> -> vector<16x128xf32>
    %11 = vector.broadcast %9 : vector<1x128xf32> to vector<16x128xf32>
    %12 = arith.addf %10, %11 : vector<16x128xf32>
    %cst_11 = arith.constant 0.000000e+00 : f32
    %13 = vector.broadcast %cst_11 : f32 to vector<16x128xf32>
    %14 = arith.maximumf %12, %13 : vector<16x128xf32>
    %c0_12 = arith.constant 0 : index
    %c0_13 = arith.constant 0 : index
    %15 = vector.load %arg6[%c0_12, %c0_13] : memref<128x32xf32, #tpu.memory_space<vmem>>, vector<128x32xf32>
    %c0_14 = arith.constant 0 : index
    %c0_15 = arith.constant 0 : index
    %16 = vector.load %arg7[%c0_14, %c0_15] : memref<1x32xf32, #tpu.memory_space<vmem>>, vector<1x32xf32>
    %cst_16 = arith.constant dense<0.000000e+00> : vector<16x32xf32>
    %17 = tpu.matmul %14, %15, %cst_16 {dimension_numbers = #tpu.dot_dimension_numbers<[1], [0], [0], [1], [0, 0, 1, 1], [], []>} : vector<16x128xf32>, vector<128x32xf32>, vector<16x32xf32> -> vector<16x32xf32>
    %18 = vector.broadcast %16 : vector<1x32xf32> to vector<16x32xf32>
    %19 = arith.addf %17, %18 : vector<16x32xf32>
    %c0_17 = arith.constant 0 : index
    %c0_18 = arith.constant 0 : index
    %20 = vector.load %arg8[%c0_17, %c0_18] : memref<16x32xf32, #tpu.memory_space<vmem>>, vector<16x32xf32>
    tpu.vector_store %arg8[%c0_17, %c0_18], %19 {strides = array<i32>} : memref<16x32xf32, #tpu.memory_space<vmem>>, vector<16x32xf32>,
    return
  }
  func.func @transform_0(%arg0: i32) -> (i32, i32) {
    %c0_i32 = arith.constant 0 : i32
    %c0_i32_0 = arith.constant 0 : i32
    return %arg0, %c0_i32 : i32, i32
  }
  func.func @transform_1(%arg0: i32) -> (i32, i32) {
    %c0_i32 = arith.constant 0 : i32
    %c0_i32_0 = arith.constant 0 : i32
    %c0_i32_1 = arith.constant 0 : i32
    return %c0_i32, %c0_i32_0 : i32, i32
  }
  func.func @transform_2(%arg0: i32) -> (i32, i32) {
    %c0_i32 = arith.constant 0 : i32
    %c0_i32_0 = arith.constant 0 : i32
    %c0_i32_1 = arith.constant 0 : i32
    return %c0_i32, %c0_i32_0 : i32, i32
  }
  func.func @transform_3(%arg0: i32) -> (i32, i32) {
    %c0_i32 = arith.constant 0 : i32
    %c0_i32_0 = arith.constant 0 : i32
    %c0_i32_1 = arith.constant 0 : i32
    return %c0_i32, %c0_i32_0 : i32, i32
  }
  func.func @transform_4(%arg0: i32) -> (i32, i32) {
    %c0_i32 = arith.constant 0 : i32
    %c0_i32_0 = arith.constant 0 : i32
    %c0_i32_1 = arith.constant 0 : i32
    return %c0_i32, %c0_i32_0 : i32, i32
  }
  func.func @transform_5(%arg0: i32) -> (i32, i32) {
    %c0_i32 = arith.constant 0 : i32
    %c0_i32_0 = arith.constant 0 : i32
    %c0_i32_1 = arith.constant 0 : i32
    return %c0_i32, %c0_i32_0 : i32, i32
  }
  func.func @transform_6(%arg0: i32) -> (i32, i32) {
    %c0_i32 = arith.constant 0 : i32
    %c0_i32_0 = arith.constant 0 : i32
    %c0_i32_1 = arith.constant 0 : i32
    return %c0_i32, %c0_i32_0 : i32, i32
  }
  func.func @transform_7(%arg0: i32) -> (i32, i32) {
    %c0_i32 = arith.constant 0 : i32
    %c0_i32_0 = arith.constant 0 : i32
    return %arg0, %c0_i32 : i32, i32
  }
}

</mosaic_0001>

<bundles_post_ra>
// kernel: tpu_custom_call.1
= control target key start
LH: loop header
LB: loop body
LE: loop exit
PB: predicated region body
PF: predicated region fallthrough
CT: control target
= control target key end

     0   :  { %12 = vsyncpa [#allocation3], 0  ;;  %s819_s0 = inlined_call_operand.vmem [shape: f32[16,64], index: 0, kind: input, shape index: {}]   ;;  %s820_s1 = inlined_call_operand.hbm [shape: f32[64,128], index: 1, kind: input, shape index: {}]   ;;  %s821_s2 = inlined_call_operand.vmem [shape: f32[1,128], index: 2, kind: input, shape index: {}]   ;;  %s822_s3 = inlined_call_operand.vmem [shape: f32[128,128], index: 3, kind: input, shape index: {}]   ;;  %s823_s4 = inlined_call_operand.vmem [shape: f32[1,128], index: 4, kind: input, shape index: {}]   ;;  %s824_s5 = inlined_call_operand.vmem [shape: f32[128,32], index: 5, kind: input, shape index: {}]   ;;  %s825_s6 = inlined_call_operand.vmem [shape: f32[1,32], index: 6, kind: input, shape index: {}]   ;;  %s826_s7 = inlined_call_operand.hbm [shape: f32[16,32], index: 7, kind: output, shape index: {}]  }
   0x1   :  { %13 = vsyncpa [#allocation4], 0  ;;  %s632_s24 = smov [#allocation2]   ;;  %s584_s28 = scalar_lea.hbm %s820_s1, 1024 }
   0x2   :  { %s21_s25 = sshll.u32 %s632_s24, 4  ;;  %p585_p0 = scmp.ne.s32.totalorder %s820_s1, %s584_s28  ;;  %s22_s25 = int_to_ptr.vmem [resolvable:$true] %s21_s25 }
   0x3   :  { %p588_p1 = scmp.lt.u32.totalorder %s584_s28, %s820_s1 }
   0x5   :  { %p590_p2 = pnand %p588_p1, %p585_p0 }
   0x7   :  { %593 = shalt.err (!%p590_p2)
}
   0x8   :  { %s594_s10 = scalar_lea.vmem %s22_s25, 1024  ;;  %p599_p4 = scmp.lt.s32.totalorder %s22_s25, %s22_s25 }
   0x9   :  { %p595_p3 = scmp.ne.s32.totalorder %s22_s25, %s594_s10  ;;  %p600_p5 = scmp.lt.s32.totalorder %s594_s10, %s594_s10 }
   0xb   :  { %p601_p6 = por %p600_p5, %p599_p4 }
   0xd   :  { %p602_p7 = pnand %p601_p6, %p595_p3 }
   0xf   :  { %605 = shalt.err (!%p602_p7)
}
  0x10   :  { %s633_s11 = smov 128   ;;  %s634_s12 = smov 8  }
  0x11   :  { %27 = dma.hbm_to_vmem [thread:$0]  %s820_s1, 1024, %s22_s25, [#allocation3], %s633_s11, %s633_s11, %s634_s12  }
  0x12   :  { %628 = dma.done.wait [#allocation3], 1024  }
  0x13   :  { %629 = vsyncadd [#allocation3], 4294966272  ;;  %v43_v0 = vld [vmem:[#allocation2] sm:$0xff]  ;;  %v44_v1 = vld [vmem:[#allocation2 + $0x8] sm:$0xff]  ;;  %vm58_vm0 = vcmask 523264   ;;  %vm340_vm1 = vcmask 261120  }
  0x14   :  { %v45_v2 = vld [vmem:[#allocation2 + $0x10] sm:$0xff]  ;;  %v500_v3 = vpack.c.bf16 %v44_v1, %v43_v0  ;;  %v46_v4 = vld [vmem:[#allocation2 + $0x18] sm:$0xff]  ;;  %v47_v6 = vld [vmem:[#allocation2 + $0x20] sm:$0xff] }
  0x15   :  { %v504_v5 = vpack.c.bf16 %v46_v4, %v45_v2  ;;  %v48_v7 = vld [vmem:[#allocation2 + $0x28] sm:$0xff]  ;;  %v41_v8 = vld [vmem:[%s819_s0] sm:$0xff]  ;;  %v144_v12 = vld [vmem:[%s822_s3 + $0x10] sm:$0xff] }
  0x16   :  { %501 = vmatprep.subr.bf16.mxu0 %v500_v3  ;;  %427 = vmatprep.mubr.msk.f32.mxu0 %vm58_vm0, %v41_v8  ;;  %v142_v9 = vld [vmem:[%s822_s3] sm:$0xff]  ;;  %v143_v10 = vld [vmem:[%s822_s3 + $0x8] sm:$0xff]  ;;  %v145_v13 = vld [vmem:[%s822_s3 + $0x18] sm:$0xff]  ;;  %v508_v14 = vpack.c.bf16 %v48_v7, %v47_v6 }
  0x17   :  { %503 = vmatpush3.bf16.msra.mxu0 %v500_v3  ;;  %v516_v11 = vpack.c.bf16 %v143_v10, %v142_v9  ;;  %v520_v15 = vpack.c.bf16 %v145_v13, %v144_v12  ;;  %v146_v16 = vld [vmem:[%s822_s3 + $0x20] sm:$0xff]  ;;  %v147_v17 = vld [vmem:[%s822_s3 + $0x28] sm:$0xff]  ;;  %v49_v18 = vld [vmem:[#allocation2 + $0x30] sm:$0xff] }
  0x18   :  { %505 = vmatprep.subr.bf16.mxu0 %v504_v5  ;;  %v50_v19 = vld [vmem:[#allocation2 + $0x38] sm:$0xff]  ;;  %v524_v20 = vpack.c.bf16 %v147_v17, %v146_v16  ;;  %v148_v22 = vld [vmem:[%s822_s3 + $0x30] sm:$0xff]  ;;  %v150_v25 = vld [vmem:[%s822_s3 + $0x40] sm:$0xff] }
  0x19   :  { %517 = vmatprep.subr.bf16.mxu1 %v516_v11  ;;  %v512_v21 = vpack.c.bf16 %v50_v19, %v49_v18  ;;  %v149_v23 = vld [vmem:[%s822_s3 + $0x38] sm:$0xff]  ;;  %v151_v26 = vld [vmem:[%s822_s3 + $0x48] sm:$0xff]  ;;  %v152_v29 = vld [vmem:[%s822_s3 + $0x50] sm:$0xff] }
  0x1a   :  { %519 = vmatpush3.bf16.msra.mxu1 %v516_v11  ;;  %v528_v24 = vpack.c.bf16 %v149_v23, %v148_v22  ;;  %v42_v27 = vld [vmem:[%s819_s0 + $0x8] sm:$0xff]  ;;  %v532_v28 = vpack.c.bf16 %v151_v26, %v150_v25  ;;  %v153_v30 = vld [vmem:[%s822_s3 + $0x58] sm:$0xff]  ;;  %v154_v32 = vld [vmem:[%s822_s3 + $0x60] sm:$0xff] }
  0x1b   :  { %507 = vmatpush3.bf16.msra.mxu0 %v504_v5  ;;  %521 = vmatprep.subr.bf16.mxu1 %v520_v15  ;;  %v536_v31 = vpack.c.bf16 %v153_v30, %v152_v29  ;;  %v155_v33 = vld [vmem:[%s822_s3 + $0x68] sm:$0xff]  ;;  %v156_v35 = vld [vmem:[%s822_s3 + $0x70] sm:$0xff]  ;;  %v157_v36 = vld [vmem:[%s822_s3 + $0x78] sm:$0xff] }
  0x1c   :  { %509 = vmatprep.subr.bf16.mxu0 %v508_v14  ;;  %v540_v34 = vpack.c.bf16 %v155_v33, %v154_v32  ;;  %v544_v37 = vpack.c.bf16 %v157_v36, %v156_v35  ;;  %v242_v38 = vld [vmem:[%s824_s5] sm:$0xff]  ;;  %v243_v39 = vld [vmem:[%s824_s5 + $0x8] sm:$0xff]  ;;  %v244_v40 = vld [vmem:[%s824_s5 + $0x10] sm:$0xff] }
  0x1d   :  { %v548_v41 = vpack.c.bf16 %v243_v39, %v242_v38  ;;  %v245_v42 = vld [vmem:[%s824_s5 + $0x18] sm:$0xff]  ;;  %v246_v44 = vld [vmem:[%s824_s5 + $0x20] sm:$0xff]  ;;  %v247_v45 = vld [vmem:[%s824_s5 + $0x28] sm:$0xff] }
  0x1e   :  { %523 = vmatpush3.bf16.msra.mxu1 %v520_v15  ;;  %v552_v43 = vpack.c.bf16 %v245_v42, %v244_v40  ;;  %v556_v46 = vpack.c.bf16 %v247_v45, %v246_v44  ;;  %v248_v47 = vld [vmem:[%s824_s5 + $0x30] sm:$0xff]  ;;  %v249_v48 = vld [vmem:[%s824_s5 + $0x38] sm:$0xff]  ;;  %v250_v50 = vld [vmem:[%s824_s5 + $0x40] sm:$0xff] }
  0x1f   :  { %511 = vmatpush3.bf16.msra.mxu0 %v508_v14  ;;  %525 = vmatprep.subr.bf16.mxu1 %v524_v20  ;;  %v560_v49 = vpack.c.bf16 %v249_v48, %v248_v47  ;;  %v251_v51 = vld [vmem:[%s824_s5 + $0x48] sm:$0xff]  ;;  %v252_v53 = vld [vmem:[%s824_s5 + $0x50] sm:$0xff]  ;;  %v253_v54 = vld [vmem:[%s824_s5 + $0x58] sm:$0xff] }
  0x20   :  { %513 = vmatprep.subr.bf16.mxu0 %v512_v21  ;;  %v564_v52 = vpack.c.bf16 %v251_v51, %v250_v50  ;;  %v568_v55 = vpack.c.bf16 %v253_v54, %v252_v53  ;;  %v254_v56 = vld [vmem:[%s824_s5 + $0x60] sm:$0xff]  ;;  %v255_v57 = vld [vmem:[%s824_s5 + $0x68] sm:$0xff]  ;;  %v256_v2 = vld [vmem:[%s824_s5 + $0x70] sm:$0xff] }
  0x21   :  { %v572_v58 = vpack.c.bf16 %v255_v57, %v254_v56  ;;  %v360_v59 = vld [vmem:[%s821_s2] ss:$0 sm:$0xff]  ;;  %v257_v3 = vld [vmem:[%s824_s5 + $0x78] sm:$0xff]  ;;  %s635_s5 = smov [#allocation5]  }
  0x22   :  { %527 = vmatpush3.bf16.msra.mxu1 %v524_v20  ;;  %v576_v4 = vpack.c.bf16 %v257_v3, %v256_v2  ;;  %v363_v5 = vld [vmem:[%s823_s4] ss:$0 sm:$0xff]  ;;  %s348_s1 = sshll.u32 %s635_s5, 4  ;;  %s349_s1 = int_to_ptr.vmem [resolvable:$true] %s348_s1 }
  0x23   :  { %515 = vmatpush3.bf16.msra.mxu0 %v512_v21  ;;  %529 = vmatprep.subr.bf16.mxu1 %v528_v24  ;;  %v364_v12 = vld [vmem:[%s825_s6] ss:$0 sm:$0xff]  ;;  %s606_s4 = scalar_lea.vmem %s349_s1, 256  ;;  %p611_p9 = scmp.lt.s32.totalorder %s349_s1, %s349_s1 }
  0x24   :  { %549 = vmatprep.subr.bf16.mxu0 %v548_v41  ;;  %p607_p8 = scmp.ne.s32.totalorder %s349_s1, %s606_s4  ;;  %p612_p10 = scmp.lt.s32.totalorder %s606_s4, %s606_s4 }
  0x26   :  { %428 = vmatmul.mubr.msk.f32.vlgmr.msra.gmra.mrb[0].mxu0 %vm58_vm0, %v42_v27  ;;  %531 = vmatpush3.bf16.msra.mxu1 %v528_v24  ;;  %p613_p11 = por %p612_p10, %p611_p9 }
  0x27   :  { %533 = vmatprep.subr.bf16.mxu1 %v532_v28  ;;  %551 = vmatpush3.bf16.msra.mxu0 %v548_v41 }
  0x28   :  { %553 = vmatprep.subr.bf16.mxu0 %v552_v43  ;;  %p614_p12 = pnand %p613_p11, %p607_p8 }
  0x2a   :  { %535 = vmatpush3.bf16.msra.mxu1 %v532_v28 }
  0x2b   :  { %537 = vmatprep.subr.bf16.mxu1 %v536_v31  ;;  %555 = vmatpush3.bf16.msra.mxu0 %v552_v43 }
  0x2c   :  { %557 = vmatprep.subr.bf16.mxu0 %v556_v46 }
  0x2e   :  { %539 = vmatpush3.bf16.msra.mxu1 %v536_v31 }
  0x2f   :  { %541 = vmatprep.subr.bf16.mxu1 %v540_v34  ;;  %559 = vmatpush3.bf16.msra.mxu0 %v556_v46 }
  0x30   :  { %561 = vmatprep.subr.bf16.mxu0 %v560_v49 }
  0x32   :  { %543 = vmatpush3.bf16.msra.mxu1 %v540_v34 }
  0x33   :  { %545 = vmatprep.subr.bf16.mxu1 %v544_v37  ;;  %563 = vmatpush3.bf16.msra.mxu0 %v560_v49 }
  0x34   :  { %565 = vmatprep.subr.bf16.mxu0 %v564_v52 }
  0x36   :  { %547 = vmatpush3.bf16.msra.mxu1 %v544_v37 }
  0x37   :  { %567 = vmatpush3.bf16.msra.mxu0 %v564_v52 }
  0x38   :  { %569 = vmatprep.subr.bf16.mxu0 %v568_v55 }
  0x3b   :  { %571 = vmatpush3.bf16.msra.mxu0 %v568_v55 }
  0x3c   :  { %573 = vmatprep.subr.bf16.mxu0 %v572_v58 }
  0x3f   :  { %575 = vmatpush3.bf16.msra.mxu0 %v572_v58 }
  0x40   :  { %577 = vmatprep.subr.bf16.mxu0 %v576_v4 }
  0x43   :  { %579 = vmatpush3.bf16.msra.mxu0 %v576_v4 }
  0xf9   :  { %v429_v60 = vpop.f32.mrb[0].mxu0 }
  0xfa   :  { %v137_v61 = vadd.f32 %v429_v60, %v360_v59  ;;  %v131_v62 = vpop.f32.mrb[1].mxu0 }
  0xfb   :  { %v132_v63 = vadd.f32 %v360_v59, %v131_v62 }
  0xfc   :  { %v141_v1 = vmax.f32 %v137_v61, 0.0 }
  0xfd   :  { %v140_v0 = vmax.f32 %v132_v63, 0.0 }
  0xff   :  { %462 = vmatprep.mubr.f32.mxu1 %v140_v0 }
 0x100   :  { %463 = vmatmul.mubr.f32.vlgmr.msra.gmra.mrb[0].mxu1 %v141_v1 }
 0x1d3   :  { %v464_v6 = vpop.f32.mrb[0].mxu1 }
 0x1d4   :  { %v237_v7 = vadd.f32 %v464_v6, %v363_v5  ;;  %v231_v8 = vpop.f32.mrb[1].mxu1 }
 0x1d5   :  { %v232_v9 = vadd.f32 %v363_v5, %v231_v8 }
 0x1d6   :  { %v241_v11 = vmax.f32 %v237_v7, 0.0 }
 0x1d7   :  { %v240_v10 = vmax.f32 %v232_v9, 0.0 }
 0x1d9   :  { %497 = vmatprep.mubr.f32.mxu0 %v240_v10 }
 0x1da   :  { %498 = vmatmul.mubr.f32.vlgmr.msra.gmra.mrb[2].mxu0 %v241_v11 }
 0x2ad   :  { %v499_v13 = vpop.f32.mrb[2].mxu0 }
 0x2ae   :  { %v337_v14 = vadd.f32 %v499_v13, %v364_v12  ;;  %v331_v15 = vpop.f32.mrb[3].mxu0 }
 0x2af   :  { %v332_v16 = vadd.f32 %v364_v12, %v331_v15 }
 0x2b0   :  { %342 = vst.msk [vmem:[#allocation5 + $0x8] sm:$0xff] %vm340_vm1, %v337_v14 }
 0x2b1   :  { %341 = vst.msk [vmem:[#allocation5] sm:$0xff] %vm340_vm1, %v332_v16 }
 0x2b2   :  { %617 = shalt.err (!%p614_p12)
}
 0x2b3   :  { %s618_s6 = scalar_lea.hbm %s826_s7, 256 }
 0x2b4   :  { %p619_p13 = scmp.ne.s32.totalorder %s826_s7, %s618_s6  ;;  %p622_p0 = scmp.lt.u32.totalorder %s618_s6, %s826_s7 }
 0x2b6   :  { %p624_p1 = pnand %p622_p0, %p619_p13 }
 0x2b8   :  { %627 = shalt.err (!%p624_p1)
}
 0x2b9   :  { %354 = dma.vmem_to_hbm [thread:$0]  %s349_s1, 256, %s826_s7, [#allocation4], %s633_s11, %s633_s11, %s634_s12  }
 0x2ba   :  { %630 = dma.done.wait [#allocation4], 256  }
 0x2bb   :  { %631 = vsyncadd [#allocation4], 4294967040 }
 0x2bc   :  { %358 = vsyncpa [#allocation3], 1 }
 0x2bd   :  { %359 = vsyncpa [#allocation4], 1 }

</bundles_post_ra>
